<compile_context>
chip_gen: v6e
topology: v6e:2x2x1
jax: 0.10.0
libtpu: 0.0.40
codegen_flags: <defaults>
</compile_context>

<pallas_src>
import functools

import jax
import jax.numpy as jnp
from jax import lax
from jax.experimental import pallas as pl
from jax.experimental.pallas import tpu as pltpu


def _pick_strip(tile: int, hidden: int) -> int:
    """Largest 128-multiple strip that divides `tile` and keeps the (H, strip)
    f32 intermediate around <= 32 vregs (32 * 1024 elements) so the whole
    fc1 -> sigmoid -> fc2 chain stays in registers within one strip."""
    for cand in (1024, 512, 256, 128):
        if tile % cand == 0 and hidden * cand <= 32 * 1024:
            return cand
    return 128  # tile is always a multiple of 128


def gmnn_kernel(xT_ref, pk_ref, b2_ref, o_ref, *, strip):
    """One batch tile: xT (3, tile) -> out (1, tile), batch on the lane axis.

    pk_ref is the packed resident parameter block (H, 5) = [w1 | b1 | w2^T].
    """
    # Hoist the tiny resident params once (outside the strip loop).
    w1_0 = pk_ref[:, 0:1]          # (H, 1)
    w1_1 = pk_ref[:, 1:2]
    w1_2 = pk_ref[:, 2:3]
    b1 = pk_ref[:, 3:4]            # (H, 1)
    w2 = pk_ref[:, 4:5]            # (H, 1) == fc2.weight^T
    b2 = b2_ref[0]                 # scalar from SMEM

    tile = o_ref.shape[-1]
    n_strips = tile // strip

    def body(s, carry):
        col = pl.multiple_of(s * strip, strip)      # 128-aligned lane offset
        xs = xT_ref[:, pl.ds(col, strip)]           # (3, strip)

        # fc1 on the VPU: h = W1 @ xs + b1, unrolled as 3 broadcast MACs
        # (K=3 on the 128/256-wide MXU would be almost entirely padding).
        h = (b1
             + w1_0 * xs[0:1, :]
             + w1_1 * xs[1:2, :]
             + w1_2 * xs[2:3, :])                   # (H, strip)

        # Sigmoid in EUP-friendly tanh form (no f32 divide on the VALU).
        h = 0.5 * (jnp.tanh(0.5 * h) + 1.0)

        # fc2: weighted sublane reduction (XLU) -> lane-dense (1, strip) row.
        y = jnp.sum(w2 * h, axis=0, keepdims=True) + b2

        # ReLU epilogue; dense 128-aligned store into the output block.
        o_ref[:, pl.ds(col, strip)] = jnp.maximum(y, 0.0).astype(o_ref.dtype)
        return carry

    # fori_loop (not a Python for) bounds live ranges of the (H, strip)
    # intermediate; unroll short trip counts for LLO scheduler visibility.
    lax.fori_loop(0, n_strips, body, 0, unroll=(n_strips <= 8))


def gmnn_forward(x, w1, b1, w2, b2, *, tile_n=8192, feature_major=False):
    """GMNN forward.

    x : (N, 3) float32, or (3, N) if feature_major=True (preferred for large
        N -- skips the wrapper-side transpose relayout pass).
    PyTorch-layout params: w1 (H, 3) = fc1.weight, b1 (H,) = fc1.bias,
                           w2 (1, H) = fc2.weight, b2 (1,) = fc2.bias.
    Returns (N, 1) float32.
    """
    if feature_major:
        xT = x.astype(jnp.float32)
        F, N = xT.shape
    else:
        N, F = x.shape
        # One extra HBM relayout pass (~1.5x the kernel's own traffic); pass
        # feature_major data to avoid it when the caller can.
        xT = x.astype(jnp.float32).T
    assert F == 3, "GMNN expects 3 input features"
    H = w1.shape[0]
    assert tile_n % 128 == 0, "tile_n must be a multiple of 128 (lane width)"

    # Clamp the tile to the 128-rounded batch; cdiv grid + Pallas edge-block
    # masking handle the ragged last tile (no jnp.pad, no padded HBM write).
    tile = min(tile_n, ((N + 127) // 128) * 128)
    strip = _pick_strip(tile, H)
    n_tiles = pl.cdiv(N, tile)

    # Pack the tiny resident params into one (H, 5) block: [w1 | b1 | w2^T].
    pk = jnp.concatenate(
        [w1.astype(jnp.float32),
         b1.reshape(H, 1).astype(jnp.float32),
         w2.reshape(H, 1).astype(jnp.float32)],
        axis=1)                                     # (H, 5)
    b2_s = b2.reshape(1).astype(jnp.float32)        # (1,) scalar in SMEM

    yT = pl.pallas_call(
        functools.partial(gmnn_kernel, strip=strip),
        out_shape=jax.ShapeDtypeStruct((1, N), jnp.float32),
        grid_spec=pltpu.PrefetchScalarGridSpec(
            num_scalar_prefetch=0,
            grid=(n_tiles,),
            in_specs=[
                pl.BlockSpec((F, tile), lambda i: (0, i)),   # xT batch tile
                # Constant index_map: block stays resident, no per-step DMA.
                pl.BlockSpec((H, 5), lambda i: (0, 0)),      # packed params
                pl.BlockSpec(memory_space=pltpu.MemorySpace.SMEM),  # b2
            ],
            out_specs=pl.BlockSpec((1, tile), lambda i: (0, i)),    # lane-dense
        ),
        compiler_params=pltpu.CompilerParams(
            dimension_semantics=("parallel",)),  # megacore-shard batch tiles
    )(xT, pk, b2_s)

    # (1, N) -> (N, 1) is a pure reshape (same element order, no relayout).
    return yT.reshape(N, 1)


def gmnn_reference(x, w1, b1, w2, b2):
    h = jax.nn.sigmoid(x @ w1.T + b1)
    return jnp.maximum(h @ w2.T + b2, 0.0)


if __name__ == "__main__":
    key = jax.random.PRNGKey(0)
    k_x, k_w1, k_b1, k_w2, k_b2 = jax.random.split(key, 5)

    # Non-multiple batch exercises the ragged-edge masking path.
    N, F, H = 2000, 3, 32

    x = jax.random.normal(k_x, (N, F), dtype=jnp.float32)

    # Deterministic PyTorch-Linear-style init, in PyTorch layout.
    bound1 = 1.0 / (F ** 0.5)
    w1 = jax.random.uniform(k_w1, (H, F), jnp.float32, -bound1, bound1)
    b1 = jax.random.uniform(k_b1, (H,), jnp.float32, -bound1, bound1)
    bound2 = 1.0 / (H ** 0.5)
    w2 = jax.random.uniform(k_w2, (1, H), jnp.float32, -bound2, bound2)
    b2 = jax.random.uniform(k_b2, (1,), jnp.float32, -bound2, bound2)

    ref = gmnn_reference(x, w1, b1, w2, b2)

    # (1) Multi-tile grid with a ragged edge tile (2000 = 3*512 + 464).
    out_multi = jax.block_until_ready(
        gmnn_forward(x, w1, b1, w2, b2, tile_n=512))
    # (2) Default large-tile path (single ragged tile, in-kernel strips).
    out_default = jax.block_until_ready(gmnn_forward(x, w1, b1, w2, b2))
    # (3) Feature-major fast path (no wrapper transpose pass).
    out_fm = jax.block_until_ready(
        gmnn_forward(x.T, w1, b1, w2, b2, feature_major=True))

    for out in (out_multi, out_default, out_fm):
        assert out.shape == (N, 1)
        assert jnp.allclose(out, ref, atol=1e-4, rtol=1e-4), "mismatch vs ref"

    print("KERNEL_OK")
</pallas_src>

<mosaic_0001>
module attributes {stable_mosaic.version = 11 : i64} {
  func.func @gmnn_kernel(%arg0: i32, %arg1: memref<3x512xf32, #tpu.memory_space<vmem>>, %arg2: memref<32x5xf32, #tpu.memory_space<vmem>>, %arg3: memref<1xf32, #tpu.memory_space<smem>>, %arg4: memref<1x512xf32, #tpu.memory_space<vmem>>) attributes {dimension_semantics = [#tpu.dimension_semantics<parallel>], iteration_bounds = array<i64: 4>, scalar_prefetch = 0 : i64, scratch_operands = 0 : i64, tpu.core_type = #tpu.core_type<tc>, window_params = [{transform_indices = @transform_0, window_bounds = array<i64: 3, 512>}, {pipeline_mode = #tpu.pipeline_mode<synchronous>, transform_indices = @transform_1, window_bounds = array<i64: 32, 5>}, {transform_indices = @transform_2, window_bounds = array<i64: 1>}, {transform_indices = @transform_3, window_bounds = array<i64: 1, 512>}]} {
    %c0 = arith.constant 0 : index
    %c0_0 = arith.constant 0 : index
    %0 = vector.load %arg2[%c0, %c0_0] : memref<32x5xf32, #tpu.memory_space<vmem>>, vector<32x1xf32>
    %c0_1 = arith.constant 0 : index
    %c1 = arith.constant 1 : index
    %1 = vector.load %arg2[%c0_1, %c1] : memref<32x5xf32, #tpu.memory_space<vmem>>, vector<32x1xf32>
    %c0_2 = arith.constant 0 : index
    %c2 = arith.constant 2 : index
    %2 = vector.load %arg2[%c0_2, %c2] : memref<32x5xf32, #tpu.memory_space<vmem>>, vector<32x1xf32>
    %c0_3 = arith.constant 0 : index
    %c3 = arith.constant 3 : index
    %3 = vector.load %arg2[%c0_3, %c3] : memref<32x5xf32, #tpu.memory_space<vmem>>, vector<32x1xf32>
    %c0_4 = arith.constant 0 : index
    %c4 = arith.constant 4 : index
    %4 = vector.load %arg2[%c0_4, %c4] : memref<32x5xf32, #tpu.memory_space<vmem>>, vector<32x1xf32>
    %c0_5 = arith.constant 0 : index
    %5 = memref.load %arg3[%c0_5] : memref<1xf32, #tpu.memory_space<smem>>
    %c0_i32 = arith.constant 0 : i32
    %c512_i32 = arith.constant 512 : i32
    %6 = arith.muli %c0_i32, %c512_i32 : i32
    %7 = tpu.assume_multiple %6, 512 : i32
    %c0_6 = arith.constant 0 : index
    %8 = arith.index_cast %7 : i32 to index
    %9 = vector.load %arg1[%c0_6, %8] : memref<3x512xf32, #tpu.memory_space<vmem>>, vector<3x512xf32>
    %10 = vector.extract_strided_slice %9 {offsets = [0, 0], sizes = [1, 512], strides = [1, 1]} : vector<3x512xf32> to vector<1x512xf32>
    %11 = vector.broadcast %0 : vector<32x1xf32> to vector<32x512xf32>
    %12 = vector.broadcast %10 : vector<1x512xf32> to vector<32x512xf32>
    %13 = arith.mulf %11, %12 : vector<32x512xf32>
    %14 = vector.broadcast %3 : vector<32x1xf32> to vector<32x512xf32>
    %15 = arith.addf %14, %13 : vector<32x512xf32>
    %16 = vector.extract_strided_slice %9 {offsets = [1, 0], sizes = [1, 512], strides = [1, 1]} : vector<3x512xf32> to vector<1x512xf32>
    %17 = vector.broadcast %1 : vector<32x1xf32> to vector<32x512xf32>
    %18 = vector.broadcast %16 : vector<1x512xf32> to vector<32x512xf32>
    %19 = arith.mulf %17, %18 : vector<32x512xf32>
    %20 = arith.addf %15, %19 : vector<32x512xf32>
    %21 = vector.extract_strided_slice %9 {offsets = [2, 0], sizes = [1, 512], strides = [1, 1]} : vector<3x512xf32> to vector<1x512xf32>
    %22 = vector.broadcast %2 : vector<32x1xf32> to vector<32x512xf32>
    %23 = vector.broadcast %21 : vector<1x512xf32> to vector<32x512xf32>
    %24 = arith.mulf %22, %23 : vector<32x512xf32>
    %25 = arith.addf %20, %24 : vector<32x512xf32>
    %cst = arith.constant 5.000000e-01 : f32
    %26 = vector.broadcast %cst : f32 to vector<32x512xf32>
    %27 = arith.mulf %26, %25 : vector<32x512xf32>
    %28 = math.tanh %27 : vector<32x512xf32>
    %cst_7 = arith.constant 1.000000e+00 : f32
    %29 = vector.broadcast %cst_7 : f32 to vector<32x512xf32>
    %30 = arith.addf %28, %29 : vector<32x512xf32>
    %cst_8 = arith.constant 5.000000e-01 : f32
    %31 = vector.broadcast %cst_8 : f32 to vector<32x512xf32>
    %32 = arith.mulf %31, %30 : vector<32x512xf32>
    %33 = vector.broadcast %4 : vector<32x1xf32> to vector<32x512xf32>
    %34 = arith.mulf %33, %32 : vector<32x512xf32>
    %cst_9 = arith.constant dense<0.000000e+00> : vector<512xf32>
    %35 = vector.multi_reduction <add>, %34, %cst_9 [0] : vector<32x512xf32> to vector<512xf32>
    %36 = vector.shape_cast %35 : vector<512xf32> to vector<1x512xf32>
    %37 = vector.broadcast %5 : f32 to vector<1x512xf32>
    %38 = arith.addf %36, %37 : vector<1x512xf32>
    %cst_10 = arith.constant 0.000000e+00 : f32
    %39 = vector.broadcast %cst_10 : f32 to vector<1x512xf32>
    %40 = arith.maximumf %38, %39 : vector<1x512xf32>
    %c0_11 = arith.constant 0 : index
    %41 = arith.index_cast %7 : i32 to index
    %42 = vector.load %arg4[%c0_11, %41] : memref<1x512xf32, #tpu.memory_space<vmem>>, vector<1x512xf32>
    tpu.vector_store %arg4[%c0_11, %41], %40 {strides = array<i32>} : memref<1x512xf32, #tpu.memory_space<vmem>>, vector<1x512xf32>,
    %c1_i32 = arith.constant 1 : i32
    return
  }
  func.func @transform_0(%arg0: i32) -> (i32, i32) {
    %c0_i32 = arith.constant 0 : i32
    %c0_i32_0 = arith.constant 0 : i32
    return %c0_i32, %arg0 : i32, i32
  }
  func.func @transform_1(%arg0: i32) -> (i32, i32) {
    %c0_i32 = arith.constant 0 : i32
    %c0_i32_0 = arith.constant 0 : i32
    %c0_i32_1 = arith.constant 0 : i32
    return %c0_i32, %c0_i32_0 : i32, i32
  }
  func.func @transform_2(%arg0: i32) -> i32 {
    %c0_i32 = arith.constant 0 : i32
    %c0_i32_0 = arith.constant 0 : i32
    return %c0_i32 : i32
  }
  func.func @transform_3(%arg0: i32) -> (i32, i32) {
    %c0_i32 = arith.constant 0 : i32
    %c0_i32_0 = arith.constant 0 : i32
    return %c0_i32, %arg0 : i32, i32
  }
}

</mosaic_0001>

<bundles_post_ra>
// kernel: tpu_custom_call.1
= control target key start
LH: loop header
LB: loop body
LE: loop exit
PB: predicated region body
PF: predicated region fallthrough
CT: control target
= control target key end

     0   :  { %s1204_s0 = inlined_call_operand.hbm [shape: f32[3,2000], index: 0, kind: input, shape index: {}]   ;;  %s1205_s1 = inlined_call_operand.vmem [shape: f32[32,5], index: 1, kind: input, shape index: {}]   ;;  %s1206_s2 = inlined_call_operand.<no memory space> [shape: f32[1], index: 2, kind: input, shape index: {}]   ;;  %s1207_s3 = inlined_call_operand.hbm [shape: f32[1,2000], index: 3, kind: output, shape index: {}]  }
   0x1   :  { %8 = sst [smem:[#allocation2]] %s1206_s2 }
   0x2   :  { %9 = vsyncpa [#allocation4], 0 }
   0x3   :  { %11 = vsyncpa [#allocation4 + $0x1], 0 }
   0x4   :  { %12 = vsyncpa [#allocation5], 0 }
   0x5   :  { %14 = vsyncpa [#allocation5 + $0x1], 0  ;;  %s971_s14 = smov 0   ;;  %s973_s15 = smov 0  }
   0x6   :  { %s975_s16 = smov 0   ;;  %s977_s17 = smov 0  }
   0x7 LB: > { %s992_s2 = sadd.s32 4294967295, %s938_s17   ;;  %s731_s18 = sadd.s32 4294967294, %s938_s17   ;;  %s938_s17 = sphi %s977_s17, %s1223_s17   ;;  %s934_s16 = sphi %s975_s16, %s1222_s16   ;;  %s930_s15 = sphi %s973_s15, %s1221_s15   ;;  %s926_s14 = sphi %s971_s14, %s1220_s14  }
   0x8   : > { %s996_s19 = sadd.s32 1, %s938_s17   ;;  %s27_s20 = sadd.s32 1, %s934_s16 }
   0x9   : > { %s24_s21 = ssub.s32 %s938_s17, %s996_s19  ;;  %p34_p0 = scmp.ne.s32.totalorder %s934_s16, %s930_s15 }
   0xa   : > { %p25_p1 = scmp.eq.s32.totalorder %s24_s21, 0  ;;  %p35_p2 = scmp.eq.s32.totalorder %s938_s17, 0 }
   0xb   : > { %p40_p3 = scmp.ne.s32.totalorder %s930_s15, %s926_s14  ;;  %p41_p4 = scmp.eq.s32.totalorder %s992_s2, 0 }
   0xc   : > { %s1008_s22 = scalar_select %p25_p1, %s934_s16, %s27_s20  }
   0xd   : > { %p1010_p5 = por %p35_p2, %p34_p0  ;;  %p1014_p6 = por %p41_p4, %p40_p3 }
   0xe   : > { %p106_p7 = scmp.eq.s32.totalorder %s992_s2, 3  ;;  %p112_p8 = scmp.eq.s32.totalorder %s731_s18, 3 }
   0xf   : > { %s1211_s24 = scalar_select %p1014_p6, 1, 0 }
  0x10   : > { %p759_p9 = scmp.lt.s32.totalorder %s938_s17, 4  ;;  %p1020_p10 = por %p106_p7, %p34_p0 }
  0x11   : > { %p1024_p11 = por %p112_p8, %p40_p3  ;;  %s138_s27 = sand.u32 1, %s934_s16  }
  0x12   : > { %s1212_s25 = scalar_select %p1020_p10, 1, 0 }
  0x13   : > { %s1213_s26 = scalar_select %p1024_p11, 1, 0 }
  0x14   : > { %s745_s28 = sshll.u32 %s938_s17, 8  ;;  %s734_s29 = sshll.u32 %s138_s27, 4 }
  0x15   : > { %s1033_s5 = scalar_lea.hbm %s1204_s0, %s745_s28  ;;  %s142_s6 = scalar_lea.vmem [#allocation3], %s734_s29 }
  0x16   : > { %s150_s7 = sshll.u32 %s142_s6, 4  ;;  %p1037_p12 = pnand %p759_p9, %p1010_p5  ;;  %s1041_s7 = int_to_ptr.vmem [resolvable:$true] %s150_s7 }
  0x17   : > { %s139_s9 = scalar_lea.sflag [#allocation4], %s138_s27  ;;  %s846_s10 = scalar_lea.hbm %s1033_s5, 256 }
  0x18   : > { %p847_p1 = scmp.ne.s32.totalorder %s1033_s5, %s846_s10  ;;  %p848_p2 = pneg %p1037_p12 }
  0x19   : > { %s851_s13 = scalar_lea.hbm %s1204_s0, 1024  ;;  %p852_p5 = scmp.lt.s32.totalorder %s1033_s5, %s1204_s0 }
  0x1a   : > { %p849_p3 = pnand %p848_p2, %p847_p1  ;;  %p853_p7 = scmp.lt.s32.totalorder %s851_s13, %s846_s10 }
  0x1c   : > { %p850_p4 = pneg %p849_p3  ;;  %p854_p8 = por %p853_p7, %p852_p5 }
  0x1e   : > { %p855_p9 = pnand %p854_p8, %p850_p4 }
  0x20   : > { %858 = shalt.err (!%p855_p9)
}
  0x21   : > { %s859_s21 = scalar_lea.vmem %s1041_s7, 256  ;;  %s940_s23 = smov [#allocation3]  }
  0x22   : > { %p860_p13 = scmp.ne.s32.totalorder %s1041_s7, %s859_s21  ;;  %s864_s27 = sshll.u32 %s940_s23, 4  ;;  %s865_s27 = int_to_ptr.vmem [resolvable:$false] %s864_s27 }
  0x23   : > { %s866_s28 = scalar_lea.vmem %s865_s27, 512  ;;  %p867_p3 = scmp.lt.s32.totalorder %s1041_s7, %s865_s27 }
  0x24   : > { %p862_p0 = pnand %p860_p13, %p848_p2  ;;  %p868_p11 = scmp.lt.s32.totalorder %s866_s28, %s859_s21 }
  0x26   : > { %p863_p1 = pneg %p862_p0  ;;  %p869_p10 = por %p868_p11, %p867_p3 }
  0x28   : > { %p870_p6 = pnand %p869_p10, %p863_p1 }
  0x2a   : > { %873 = shalt.err (!%p870_p6)
}
  0x2b   : > { %754 = dma.hbm_to_vmem [thread:$0]  (!%p1037_p12), %s1033_s5, 256, %s1041_s7, %s139_s9  }
  0x2c   : > { %p1215_p4 = scmp.lt.s32.totalorder %s938_s17, 5  ;;  %p1216_p5 = scmp.ge.s32.totalorder %s938_s17, 1 }
  0x2e   : > { %p156_p13 = pnand %p1216_p5, %p1215_p4 }
  0x2f   : > { %s1068_s29 = sand.u32 (!%p156_p13), 1, %s930_s15   ;;  %p1217_p6 = scmp.ne.s32.totalorder (!%p156_p13), %s1211_s24, 0 }
  0x30   : > { %159 = sbr.rel (%p156_p13) target bundleno = 292 (0x124), region = 32  ;;  %s738_s30 = sshll.u32 (!%p156_p13), %s1068_s29, 4 }
  0x31   : > { %s162_s4 = scalar_lea.sflag (!%p156_p13), [#allocation4], %s1068_s29  ;;  %s1072_s6 = scalar_lea.vmem (!%p156_p13), [#allocation3], %s738_s30 }
  0x35   : > { %917 = dma.done.wait (%p1217_p6), %s162_s4, 256  }
  0x36   : > { %919 = vsyncadd (%p1217_p6), %s162_s4, 4294967040  ;;  %v941_v0 = vmov 0   ;;  %v192_v1 = vld [vmem:[%s1205_s1 + $0x10] sm:$0xff]  ;;  %v190_v2 = vld [vmem:[%s1205_s1] sm:$0xff]  ;;  %v942_v4 = vmov 3   ;;  %v943_v5 = vmov 1   ;;  %v219_v9 = vlaneseq }
  0x37   : > { %800 = vset.pattern.permute.xlu1 %v941_v0  ;;  %799 = vset.pattern.permute.xlu0 %v941_v0  ;;  %v191_v3 = vld [vmem:[%s1205_s1 + $0x8] sm:$0xff]  ;;  %v193_v6 = vld [vmem:[%s1205_s1 + $0x18] sm:$0xff]  ;;  %v944_v7 = vmov 2   ;;  %v945_v8 = vmov 4   ;;  %v195_v15 = vld [vmem:[%s1072_s6] sm:$0x77] }
  0x38   : > { %209 = vperm.xlu1 %800, %v192_v1   ;;  %199 = vperm.xlu0 %799, %v190_v2   ;;  %v1091_v10 = vshrl.u32 %v219_v9, 7  ;;  %v196_v18 = vld [vmem:[%s1072_s6 + $0x8] sm:$0x77]  ;;  %s194_s13 = sld [smem:[#allocation2]]  ;;  %s739_s18 = sshll.u32 %s1068_s29, 2  ;;  %vm643_vm0 = vcmp.lt.s32.totalorder %v219_v9, 512 }
  0x39   : > { %s746_s20 = sshll.u32 %s992_s2, 6  ;;  %s187_s21 = scalar_lea.vmem [#allocation6], %s739_s18 }
  0x3a   : > { %v221_v13 = vsub.s32 0, %v1091_v10  ;;  %v225_v14 = vsub.s32 4, %v1091_v10  ;;  %v321_v19 = vsub.s32 1, %v1091_v10  ;;  %v325_v20 = vsub.s32 5, %v1091_v10  ;;  %s661_s23 = sshll.u32 %s187_s21, 4  ;;  %s659_s30 = scalar_lea.hbm %s1207_s3, %s746_s20  ;;  %s662_s23 = int_to_ptr.vmem [resolvable:$true] %s661_s23 }
  0x3b   : > { %v405_v24 = vsub.s32 2, %v1091_v10  ;;  %v409_v25 = vsub.s32 6, %v1091_v10  ;;  %s647_s4 = scalar_lea.sflag [#allocation5], %s1068_s29  ;;  %s874_s6 = scalar_lea.vmem %s662_s23, 64 }
  0x3c   : > { %801 = vset.pattern.permute.xlu1 %v942_v4  ;;  %802 = vset.pattern.permute.xlu0 %v942_v4  ;;  %v222_v21 = vrot.slane %v195_v15, %v221_v13  ;;  %v226_v22 = vrot.slane %v195_v15, %v225_v14  ;;  %v230_v23 = vrot.slane %v196_v18, %v221_v13  ;;  %p875_p10 = scmp.ne.s32.totalorder %s662_s23, %s874_s6  ;;  %p1218_p11 = scmp.ne.s32.totalorder %s1212_s25, 0 }
  0x3d   : > { %272 = vperm.xlu1 %801, %v190_v2   ;;  %276 = vperm.xlu0 %802, %v191_v3   ;;  %v322_v26 = vrot.slane %v195_v15, %v321_v19  ;;  %v326_v27 = vrot.slane %v195_v15, %v325_v20  ;;  %v330_v28 = vrot.slane %v196_v18, %v321_v19  ;;  %s947_s5 = smov [#allocation6]  }
  0x3e   : > { %v234_v31 = vrot.slane %v196_v18, %v225_v14  ;;  %v334_v32 = vrot.slane %v196_v18, %v325_v20  ;;  %v242_v33 = vrot.slane %v222_v21, %v221_v13  ;;  %v246_v34 = vrot.slane %v226_v22, %v221_v13  ;;  %p876_p12 = pnand %p875_p10, %p1218_p11  ;;  %s878_s2 = sshll.u32 %s947_s5, 4  ;;  %s879_s2 = int_to_ptr.vmem [resolvable:$false] %s878_s2 }
  0x3f   : > { %v250_v35 = vrot.slane %v230_v23, %v221_v13  ;;  %v406_v36 = vrot.slane %v195_v15, %v405_v24  ;;  %v410_v37 = vrot.slane %v195_v15, %v409_v25  ;;  %v414_v38 = vrot.slane %v196_v18, %v405_v24  ;;  %s880_s7 = scalar_lea.vmem %s879_s2, 128  ;;  %p881_p2 = scmp.lt.s32.totalorder %s662_s23, %s879_s2 }
  0x40   : > { %v1105_v39 = vrot.slane %v322_v26, %v321_v19  ;;  %v1107_v40 = vrot.slane %v326_v27, %v321_v19  ;;  %v1109_v41 = vrot.slane %v330_v28, %v321_v19  ;;  %v418_v44 = vrot.slane %v196_v18, %v409_v25  ;;  %p877_p0 = pneg %p876_p12  ;;  %p882_p7 = scmp.lt.s32.totalorder %s880_s7, %s874_s6 }
  0x41   : > { %804 = vset.pattern.permute.xlu1 %v943_v5  ;;  %803 = vset.pattern.permute.xlu0 %v941_v0  ;;  %v254_v45 = vrot.slane %v234_v31, %v221_v13  ;;  %v1111_v48 = vrot.slane %v334_v32, %v321_v19  ;;  %v1113_v51 = vrot.slane %v406_v36, %v405_v24 }
  0x42   : > { %304 = vperm.xlu1 %804, %v190_v2   ;;  %204 = vperm.xlu0 %803, %v191_v3   ;;  %v1115_v52 = vrot.slane %v410_v37, %v405_v24  ;;  %v1117_v53 = vrot.slane %v414_v38, %v405_v24  ;;  %v1122_v57 = vrot.slane %v418_v44, %v405_v24  ;;  %p883_p8 = por %p882_p7, %p881_p2 }
  0x44   : > { %p884_p9 = pnand %p883_p8, %p877_p0 }
  0x46   : > { %308 = vperm.xlu1 %804, %v191_v3   ;;  %214 = vperm.xlu0 %803, %v193_v6  }
  0x4a   : > { %805 = vset.pattern.permute.xlu1 %v942_v4  ;;  %807 = vset.pattern.permute.xlu0 %v944_v7 }
  0x4b   : > { %280 = vperm.xlu1 %805, %v192_v1   ;;  %388 = vperm.xlu0 %807, %v190_v2  }
  0x4f   : > { %806 = vset.pattern.permute.xlu1 %v943_v5  ;;  %810 = vset.pattern.permute.xlu0 %v943_v5 }
  0x50   : > { %312 = vperm.xlu1 %806, %v192_v1   ;;  %316 = vperm.xlu0 %810, %v193_v6  }
  0x54   : > { %808 = vset.pattern.permute.xlu1 %v944_v7  ;;  %812 = vset.pattern.permute.xlu0 %v945_v8 }
  0x55   : > { %392 = vperm.xlu1 %808, %v191_v3   ;;  %536 = vperm.xlu0 %812, %v190_v2  }
  0x59   : > { %809 = vset.pattern.permute.xlu1 %v942_v4  ;;  %548 = vperm.xlu0 %812, %v193_v6  }
  0x5a   : > { %284 = vperm.xlu1 %809, %v193_v6  }
  0x5e   : > { %811 = vset.pattern.permute.xlu1 %v944_v7 }
  0x5f   : > { %396 = vperm.xlu1 %811, %v192_v1  }
  0x63   : > { %400 = vperm.xlu1 %811, %v193_v6  }
  0x67   : > { %813 = vset.pattern.permute.xlu1 %v945_v8 }
  0x68   : > { %540 = vperm.xlu1 %813, %v191_v3  }
  0x6c   : > { %544 = vperm.xlu1 %813, %v192_v1  }
  0xb3   : > { %v1093_v11 = vpop.permute.xlu1 %209  ;;  %v200_v12 = vpop.permute.xlu0 %199 }
  0xb4   : > { %v255_v46 = vmul.f32 %v242_v33, %v200_v12  ;;  %v256_v47 = vmul.f32 %v246_v34, %v200_v12  ;;  %v257_v49 = vmul.f32 %v250_v35, %v200_v12  ;;  %v258_v50 = vmul.f32 %v254_v45, %v200_v12 }
  0xb5   : > { %v263_v27 = vmul.f32 %v242_v33, %v1093_v11  ;;  %v264_v28 = vmul.f32 %v246_v34, %v1093_v11  ;;  %v266_v31 = vmul.f32 %v254_v45, %v1093_v11 }
  0xb8   : > { %v273_v16 = vpop.permute.xlu1 %272  ;;  %v1098_v17 = vpop.permute.xlu0 %276 }
  0xb9   : > { %v287_v58 = vadd.f32 %v273_v16, %v255_v46  ;;  %v288_v59 = vadd.f32 %v273_v16, %v256_v47  ;;  %v289_v0 = vadd.f32 %v273_v16, %v257_v49  ;;  %v290_v4 = vadd.f32 %v273_v16, %v258_v50 }
  0xbd   : > { %v305_v29 = vpop.permute.xlu1 %304  ;;  %v205_v30 = vpop.permute.xlu0 %204 }
  0xbe   : > { %v355_v54 = vmul.f32 %v1105_v39, %v305_v29  ;;  %v356_v55 = vmul.f32 %v1107_v40, %v305_v29  ;;  %v357_v56 = vmul.f32 %v1109_v41, %v305_v29  ;;  %v358_v60 = vmul.f32 %v1111_v48, %v305_v29 }
  0xbf   : > { %v259_v61 = vmul.f32 %v242_v33, %v205_v30  ;;  %v260_v1 = vmul.f32 %v246_v34, %v205_v30  ;;  %v261_v2 = vmul.f32 %v250_v35, %v205_v30  ;;  %v262_v3 = vmul.f32 %v254_v45, %v205_v30 }
  0xc0   : > { %v371_v6 = vadd.f32 %v355_v54, %v287_v58  ;;  %v372_v7 = vadd.f32 %v356_v55, %v288_v59  ;;  %v373_v8 = vadd.f32 %v357_v56, %v289_v0  ;;  %v374_v13 = vadd.f32 %v358_v60, %v290_v4 }
  0xc1   : > { %v309_v42 = vpop.permute.xlu1 %308  ;;  %v215_v43 = vpop.permute.xlu0 %214  ;;  %v291_v14 = vadd.f32 %v1098_v17, %v259_v61  ;;  %v292_v19 = vadd.f32 %v1098_v17, %v260_v1  ;;  %v293_v20 = vadd.f32 %v1098_v17, %v261_v2  ;;  %v294_v16 = vadd.f32 %v1098_v17, %v262_v3 }
  0xc2   : > { %v359_v21 = vmul.f32 %v1105_v39, %v309_v42  ;;  %v360_v23 = vmul.f32 %v1107_v40, %v309_v42  ;;  %v361_v24 = vmul.f32 %v1109_v41, %v309_v42  ;;  %v362_v25 = vmul.f32 %v1111_v48, %v309_v42 }
  0xc3   : > { %v265_v29 = vmul.f32 %v250_v35, %v1093_v11  ;;  %v267_v17 = vmul.f32 %v242_v33, %v215_v43  ;;  %v268_v38 = vmul.f32 %v246_v34, %v215_v43  ;;  %v269_v44 = vmul.f32 %v250_v35, %v215_v43 }
  0xc4   : > { %v375_v37 = vadd.f32 %v359_v21, %v291_v14  ;;  %v270_v46 = vmul.f32 %v254_v45, %v215_v43  ;;  %v376_v47 = vadd.f32 %v360_v23, %v292_v19  ;;  %v377_v49 = vadd.f32 %v361_v24, %v293_v20 }
  0xc5   : > { %v378_v42 = vadd.f32 %v362_v25, %v294_v16 }
  0xc6   : > { %v1125_v62 = vpop.permute.xlu1 %280  ;;  %v389_v63 = vpop.permute.xlu0 %388 }
  0xc7   : > { %v439_v5 = vmul.f32 %v1113_v51, %v389_v63  ;;  %v440_v12 = vmul.f32 %v1115_v52, %v389_v63  ;;  %v441_v15 = vmul.f32 %v1117_v53, %v389_v63  ;;  %v442_v18 = vmul.f32 %v1122_v57, %v389_v63 }
  0xc8   : > { %v295_v11 = vadd.f32 %v1125_v62, %v263_v27 }
  0xc9   : > { %v455_v26 = vadd.f32 %v439_v5, %v371_v6  ;;  %v456_v30 = vadd.f32 %v440_v12, %v372_v7  ;;  %v457_v32 = vadd.f32 %v441_v15, %v373_v8  ;;  %v458_v36 = vadd.f32 %v442_v18, %v374_v13 }
  0xca   : > { %v296_v7 = vadd.f32 %v1125_v62, %v264_v28  ;;  %v297_v8 = vadd.f32 %v1125_v62, %v265_v29  ;;  %v298_v13 = vadd.f32 %v1125_v62, %v266_v31 }
  0xcb   : > { %v313_v22 = vpop.permute.xlu1 %312  ;;  %v471_v50 = vmul.f32 0.5, %v455_v26  ;;  %v472_v55 = vmul.f32 0.5, %v456_v30  ;;  %v473_v33 = vmul.f32 0.5, %v457_v32  ;;  %v474_v60 = vmul.f32 0.5, %v458_v36  ;;  %v317_v2 = vpop.permute.xlu0 %316 }
  0xcc   : > { %v363_v35 = vmul.f32 %v1105_v39, %v313_v22  ;;  %v364_v63 = vmul.f32 %v1107_v40, %v313_v22  ;;  %v365_v0 = vmul.f32 %v1109_v41, %v313_v22  ;;  %v366_v3 = vmul.f32 %v1111_v48, %v313_v22 }
  0xcd   : > { %814 = vtanh.f32 %v471_v50  ;;  %v367_v14 = vmul.f32 %v1105_v39, %v317_v2  ;;  %v368_v15 = vmul.f32 %v1107_v40, %v317_v2  ;;  %v369_v20 = vmul.f32 %v1109_v41, %v317_v2 }
  0xce   : > { %816 = vtanh.f32 %v472_v55  ;;  %v379_v18 = vadd.f32 %v363_v35, %v295_v11  ;;  %v380_v16 = vadd.f32 %v364_v63, %v296_v7  ;;  %v381_v21 = vadd.f32 %v365_v0, %v297_v8 }
  0xcf   : > { %818 = vtanh.f32 %v473_v33  ;;  %v382_v22 = vadd.f32 %v366_v3, %v298_v13  ;;  %v370_v41 = vmul.f32 %v1111_v48, %v317_v2 }
  0xd0   : > { %v393_v54 = vpop.permute.xlu1 %392  ;;  %820 = vtanh.f32 %v474_v60 }
  0xd1   : > { %v443_v56 = vmul.f32 %v1113_v51, %v393_v54  ;;  %v444_v58 = vmul.f32 %v1115_v52, %v393_v54  ;;  %v445_v59 = vmul.f32 %v1117_v53, %v393_v54  ;;  %v446_v34 = vmul.f32 %v1122_v57, %v393_v54 }
  0xd3   : > { %v459_v43 = vadd.f32 %v443_v56, %v375_v37  ;;  %v460_v45 = vadd.f32 %v444_v58, %v376_v47  ;;  %v461_v61 = vadd.f32 %v445_v59, %v377_v49  ;;  %v462_v1 = vadd.f32 %v446_v34, %v378_v42 }
  0xd5   : > { %v475_v4 = vmul.f32 0.5, %v459_v43  ;;  %v476_v5 = vmul.f32 0.5, %v460_v45  ;;  %v285_v6 = vpop.permute.xlu1 %284  ;;  %v477_v12 = vmul.f32 0.5, %v461_v61  ;;  %v478_v19 = vmul.f32 0.5, %v462_v1 }
  0xd6   : > { %v299_v23 = vadd.f32 %v285_v6, %v267_v17  ;;  %v300_v24 = vadd.f32 %v285_v6, %v268_v38  ;;  %v301_v25 = vadd.f32 %v285_v6, %v269_v44  ;;  %v302_v28 = vadd.f32 %v285_v6, %v270_v46 }
  0xd7   : > { %822 = vtanh.f32 %v475_v4 }
  0xd8   : > { %824 = vtanh.f32 %v476_v5  ;;  %v383_v17 = vadd.f32 %v367_v14, %v299_v23  ;;  %v384_v36 = vadd.f32 %v368_v15, %v300_v24  ;;  %v385_v37 = vadd.f32 %v369_v20, %v301_v25 }
  0xd9   : > { %826 = vtanh.f32 %v477_v12  ;;  %v386_v56 = vadd.f32 %v370_v41, %v302_v28 }
  0xda   : > { %v397_v26 = vpop.permute.xlu1 %396  ;;  %828 = vtanh.f32 %v478_v19  ;;  %v815_v55 = vpop.eup %814 }
  0xdb   : > { %v447_v62 = vmul.f32 %v1113_v51, %v397_v26  ;;  %v448_v39 = vmul.f32 %v1115_v52, %v397_v26  ;;  %v449_v40 = vmul.f32 %v1117_v53, %v397_v26  ;;  %v450_v27 = vmul.f32 %v1122_v57, %v397_v26  ;;  %v817_v58 = vpop.eup %816  ;;  %v537_v19 = vpop.permute.xlu0 %536 }
  0xdc   : > { %v819_v60 = vpop.eup %818  ;;  %v503_v0 = vadd.f32 1.0, %v815_v55  ;;  %v504_v2 = vadd.f32 1.0, %v817_v58 }
  0xdd   : > { %v463_v29 = vadd.f32 %v447_v62, %v379_v18  ;;  %v464_v30 = vadd.f32 %v448_v39, %v380_v16  ;;  %v465_v31 = vadd.f32 %v449_v40, %v381_v21  ;;  %v466_v32 = vadd.f32 %v450_v27, %v382_v22  ;;  %v821_v35 = vpop.eup %820 }
  0xde   : > { %v401_v38 = vpop.permute.xlu1 %400  ;;  %v505_v3 = vadd.f32 1.0, %v819_v60  ;;  %v506_v6 = vadd.f32 1.0, %v821_v35  ;;  %v519_v12 = vmul.f32 0.5, %v503_v0  ;;  %v520_v15 = vmul.f32 0.5, %v504_v2 }
  0xdf   : > { %v479_v44 = vmul.f32 0.5, %v463_v29  ;;  %v480_v47 = vmul.f32 0.5, %v464_v30  ;;  %v481_v49 = vmul.f32 0.5, %v465_v31  ;;  %v482_v42 = vmul.f32 0.5, %v466_v32 }
  0xe0   : > { %v451_v50 = vmul.f32 %v1113_v51, %v401_v38  ;;  %v452_v54 = vmul.f32 %v1115_v52, %v401_v38  ;;  %v453_v46 = vmul.f32 %v1117_v53, %v401_v38  ;;  %v454_v48 = vmul.f32 %v1122_v57, %v401_v38 }
  0xe1   : > { %830 = vtanh.f32 %v479_v44  ;;  %v521_v18 = vmul.f32 0.5, %v505_v3  ;;  %v522_v26 = vmul.f32 0.5, %v506_v6  ;;  %v551_v27 = vmul.f32 %v537_v19, %v519_v12 }
  0xe2   : > { %832 = vtanh.f32 %v480_v47  ;;  %v467_v59 = vadd.f32 %v451_v50, %v383_v17  ;;  %v468_v11 = vadd.f32 %v452_v54, %v384_v36  ;;  %v469_v33 = vadd.f32 %v453_v46, %v385_v37 }
  0xe3   : > { %834 = vtanh.f32 %v481_v49  ;;  %v470_v34 = vadd.f32 %v454_v48, %v386_v56  ;;  %v541_v20 = vpop.permute.xlu1 %540  ;;  %v552_v31 = vmul.f32 %v537_v19, %v520_v15  ;;  %v553_v32 = vmul.f32 %v537_v19, %v521_v18 }
  0xe4   : > { %836 = vtanh.f32 %v482_v42  ;;  %v483_v51 = vmul.f32 0.5, %v467_v59  ;;  %v484_v43 = vmul.f32 0.5, %v468_v11  ;;  %v485_v52 = vmul.f32 0.5, %v469_v33  ;;  %v823_v45 = vpop.eup %822 }
  0xe5   : > { %v486_v53 = vmul.f32 0.5, %v470_v34  ;;  %v825_v61 = vpop.eup %824  ;;  %v507_v1 = vadd.f32 1.0, %v823_v45  ;;  %v554_v54 = vmul.f32 %v537_v19, %v522_v26 }
  0xe6   : > { %838 = vtanh.f32 %v483_v51  ;;  %v827_v57 = vpop.eup %826  ;;  %v508_v4 = vadd.f32 1.0, %v825_v61 }
  0xe7   : > { %840 = vtanh.f32 %v484_v43  ;;  %v829_v63 = vpop.eup %828  ;;  %v509_v5 = vadd.f32 1.0, %v827_v57  ;;  %v523_v13 = vmul.f32 0.5, %v507_v1  ;;  %v545_v37 = vpop.permute.xlu1 %544 }
  0xe8   : > { %842 = vtanh.f32 %v485_v52  ;;  %v510_v7 = vadd.f32 1.0, %v829_v63  ;;  %v524_v16 = vmul.f32 0.5, %v508_v4  ;;  %v549_v43 = vpop.permute.xlu0 %548 }
  0xe9   : > { %844 = vtanh.f32 %v486_v53  ;;  %v525_v23 = vmul.f32 0.5, %v509_v5  ;;  %v555_v28 = vmul.f32 %v541_v20, %v523_v13 }
  0xea   : > { %v526_v62 = vmul.f32 0.5, %v510_v7  ;;  %v556_v17 = vmul.f32 %v541_v20, %v524_v16 }
  0xeb   : > { %v557_v44 = vmul.f32 %v541_v20, %v525_v23  ;;  %v567_v59 = vadd.f32 %v555_v28, %v551_v27 }
  0xec   : > { %v558_v46 = vmul.f32 %v541_v20, %v526_v62  ;;  %v576_v34 = vadd.f32 %v556_v17, %v552_v31 }
  0xed   : > { %v585_v45 = vadd.f32 %v557_v44, %v553_v32 }
  0xee   : > { %v831_v8 = vpop.eup %830  ;;  %v594_v63 = vadd.f32 %v558_v46, %v554_v54 }
  0xef   : > { %v833_v14 = vpop.eup %832  ;;  %v511_v21 = vadd.f32 1.0, %v831_v8 }
  0xf0   : > { %v835_v22 = vpop.eup %834  ;;  %v512_v24 = vadd.f32 1.0, %v833_v14 }
  0xf1   : > { %v837_v25 = vpop.eup %836  ;;  %v513_v39 = vadd.f32 1.0, %v835_v22  ;;  %v527_v40 = vmul.f32 0.5, %v511_v21 }
  0xf2   : > { %v514_v41 = vadd.f32 1.0, %v837_v25  ;;  %v528_v29 = vmul.f32 0.5, %v512_v24 }
  0xf3   : > { %v839_v30 = vpop.eup %838  ;;  %v529_v36 = vmul.f32 0.5, %v513_v39  ;;  %v559_v49 = vmul.f32 %v545_v37, %v527_v40  ;;  %v946_v39 = vmov 1966171168  }
  0xf4   : > { %v841_v38 = vpop.eup %840  ;;  %v530_v47 = vmul.f32 0.5, %v514_v41  ;;  %v515_v42 = vadd.f32 1.0, %v839_v30  ;;  %v560_v48 = vmul.f32 %v545_v37, %v528_v29  ;;  %v619_v40 = vunpack.c.l.s4 %v946_v39 }
  0xf5   : > { %v843_v50 = vpop.eup %842  ;;  %v516_v55 = vadd.f32 1.0, %v841_v38  ;;  %v561_v58 = vmul.f32 %v545_v37, %v529_v36  ;;  %v568_v52 = vadd.f32 %v567_v59, %v559_v49  ;;  %v603_v41 = vstv %s194_s13 }
  0xf6   : > { %v845_v56 = vpop.eup %844  ;;  %v517_v11 = vadd.f32 1.0, %v843_v50  ;;  %v531_v33 = vmul.f32 0.5, %v515_v42  ;;  %v562_v60 = vmul.f32 %v545_v37, %v530_v47  ;;  %v577_v57 = vadd.f32 %v576_v34, %v560_v48 }
  0xf7   : > { %v518_v35 = vadd.f32 1.0, %v845_v56  ;;  %v532_v51 = vmul.f32 0.5, %v516_v55  ;;  %v586_v2 = vadd.f32 %v585_v45, %v561_v58  ;;  %v620_v37 = vunpack.c.0.s8 %v619_v40 }
  0xf8   : > { %v533_v53 = vmul.f32 0.5, %v517_v11  ;;  %v563_v61 = vmul.f32 %v549_v43, %v531_v33  ;;  %v595_v5 = vadd.f32 %v594_v63, %v562_v60 }
  0xf9   : > { %v534_v0 = vmul.f32 0.5, %v518_v35  ;;  %v564_v1 = vmul.f32 %v549_v43, %v532_v51  ;;  %v623_v48 = vsub.s32 %v620_v37, %v1091_v10 }
  0xfa   : > { %v565_v3 = vmul.f32 %v549_v43, %v533_v53  ;;  %v569_v4 = vadd.f32 %v568_v52, %v563_v61 }
  0xfb   : > { %v566_v6 = vmul.f32 %v549_v43, %v534_v0  ;;  %v578_v7 = vadd.f32 %v577_v57, %v564_v1 }
  0xfc   : > { %v570_v8 = vrot.slane %v569_v4, 4  ;;  %v587_v12 = vadd.f32 %v586_v2, %v565_v3 }
  0xfd   : > { %v579_v13 = vrot.slane %v578_v7, 4  ;;  %v596_v14 = vadd.f32 %v595_v5, %v566_v6 }
  0xfe   : > { %v571_v15 = vadd.f32 %v570_v8, %v569_v4  ;;  %v588_v18 = vrot.slane %v587_v12, 4 }
  0xff   : > { %v580_v19 = vadd.f32 %v579_v13, %v578_v7  ;;  %v597_v20 = vrot.slane %v596_v14, 4 }
 0x100   : > { %v572_v16 = vrot.slane %v571_v15, 2  ;;  %v589_v21 = vadd.f32 %v588_v18, %v587_v12 }
 0x101   : > { %v581_v22 = vrot.slane %v580_v19, 2  ;;  %v598_v23 = vadd.f32 %v597_v20, %v596_v14 }
 0x102   : > { %v573_v24 = vadd.f32 %v572_v16, %v571_v15  ;;  %v590_v25 = vrot.slane %v589_v21, 2 }
 0x103   : > { %v582_v26 = vadd.f32 %v581_v22, %v580_v19  ;;  %v599_v62 = vrot.slane %v598_v23, 2 }
 0x104   : > { %v574_v27 = vrot.slane %v573_v24, 1  ;;  %v591_v28 = vadd.f32 %v590_v25, %v589_v21 }
 0x105   : > { %v583_v29 = vrot.slane %v582_v26, 1  ;;  %v600_v30 = vadd.f32 %v599_v62, %v598_v23 }
 0x106   : > { %v575_v31 = vadd.f32 %v574_v27, %v573_v24  ;;  %v592_v32 = vrot.slane %v591_v28, 1 }
 0x107   : > { %v584_v17 = vadd.f32 %v583_v29, %v582_v26  ;;  %v601_v36 = vrot.slane %v600_v30, 1 }
 0x108   : > { %v593_v38 = vadd.f32 %v592_v32, %v591_v28  ;;  %v604_v44 = vadd.f32 %v603_v41, %v575_v31 }
 0x109   : > { %v602_v47 = vadd.f32 %v601_v36, %v600_v30  ;;  %v605_v49 = vadd.f32 %v603_v41, %v584_v17 }
 0x10a   : > { %v606_v42 = vadd.f32 %v603_v41, %v593_v38  ;;  %v608_v50 = vmax.f32 %v604_v44, 0.0 }
 0x10b   : > { %v607_v54 = vadd.f32 %v603_v41, %v602_v47  ;;  %v609_v46 = vmax.f32 %v605_v49, 0.0 }
 0x10c   : > { %v610_v55 = vmax.f32 %v606_v42, 0.0 }
 0x10d   : > { %v611_v56 = vmax.f32 %v607_v54, 0.0  ;;  %v616_v58 = vcombine.low %v608_v50, %v609_v46 }
 0x10f   : > { %v617_v59 = vcombine.low %v610_v55, %v611_v56  ;;  %v624_v11 = vrot.slane %v616_v58, %v623_v48 }
 0x111   : > { %v631_v33 = vrot.slane %v617_v59, %v623_v48 }
 0x113   : > { %v632_v60 = vcombine.low %v624_v11, %v631_v33 }
 0x115   : > { %v639_v34 = vrot.slane %v632_v60, %v623_v48 }
 0x117   : > { %645 = vst.msk [vmem:[%s187_s21] sm:$0xf] %vm643_vm0, %v639_v34 }
 0x118   : > { %887 = shalt.err (!%p884_p9)
}
 0x119   : > { %s888_s8 = scalar_lea.hbm %s659_s30, 64  ;;  %s892_s10 = scalar_lea.hbm %s1207_s3, 256 }
 0x11a   : > { %p889_p1 = scmp.ne.s32.totalorder %s659_s30, %s888_s8  ;;  %p893_p5 = scmp.lt.s32.totalorder %s659_s30, %s1207_s3 }
 0x11b   : > { %p894_p13 = scmp.lt.s32.totalorder %s892_s10, %s888_s8 }
 0x11c   : > { %p890_p3 = pnand %p889_p1, %p1218_p11 }
 0x11d   : > { %p895_p6 = por %p894_p13, %p893_p5 }
 0x11e   : > { %p891_p4 = pneg %p890_p3 }
 0x120   : > { %p896_p10 = pnand %p895_p6, %p891_p4 }
 0x122   : > { %899 = shalt.err (!%p896_p10)
}
 0x123   : > { %749 = dma.vmem_to_hbm [thread:$0]  (%p1218_p11), %s662_s23, 64, %s659_s30, %s647_s4  }
 0x124 PF: > { %p760_p12 = scmp.ge.s32.totalorder %s938_s17, 2  ;;  %s673_s12 = sand.u32 1, %s926_s14  }
 0x125   : > { %p1219_p0 = scmp.ne.s32.totalorder %s1213_s26, 0  ;;  %s674_s13 = scalar_lea.sflag [#allocation5], %s673_s12 }
 0x127   : > { %p756_p2 = pnand %p760_p12, %p1219_p0 }
 0x129   : > { %p757_p7 = pneg %p756_p2 }
 0x12b   : > { %921 = dma.done.wait (%p757_p7), %s674_s13, 64  }
 0x12c   : > { %923 = vsyncadd (%p757_p7), %s674_s13, 4294967232  ;;  %p17_p8 = scmp.ge.s32.totalorder %s996_s19, 6   ;;  %s1220_s14 = smov %s930_s15 }
 0x12d   : > { %s1221_s15 = smov %s934_s16  ;;  %s1222_s16 = smov %s1008_s22 }
 0x12e   : > { %s1223_s17 = smov %s996_s19  ;;  %19 = sbr.rel (!%p17_p8) target bundleno = 7 (0x7), region = 77 }
 0x133   :  { %679 = vsyncpa [#allocation4], 1 }
 0x134   :  { %681 = vsyncpa [#allocation4 + $0x1], 1 }
 0x135   :  { %682 = vsyncpa [#allocation5], 1 }
 0x136   :  { %684 = vsyncpa [#allocation5 + $0x1], 1 }

</bundles_post_ra>
